<compile_context>
chip_gen: v7x
topology: tpu7x:2x2x1
jax: 0.10.0
libtpu: 0.0.40
codegen_flags: <defaults>
</compile_context>

<pallas_src>
import functools

import jax
import jax.numpy as jnp
from jax.experimental import pallas as pl
from jax.experimental.pallas import tpu as pltpu

LANE = 128
SUBLANE = 8


def _round_up(x, m):
    return ((x + m - 1) // m) * m


def _pad_axis(x, axis, target):
    pad = target - x.shape[axis]
    if pad == 0:
        return x
    widths = [(0, 0)] * x.ndim
    widths[axis] = (0, pad)
    return jnp.pad(x, widths)


# --------------------------------------------------------------------------
# Kernel: fused 3-layer MLP (Linear+ReLU, Linear+ReLU, Linear+Tanh).
# --------------------------------------------------------------------------
def generator_mlp_kernel(z_ref, w1_ref, b1_ref, w2_ref, b2_ref, w3_ref, b3_ref,
                         out_ref):
    # Layer 1: bf16 operands, f32 MXU accumulate, f32 bias+ReLU epilogue.
    z = z_ref[...].astype(jnp.bfloat16)          # in-register cast (no HBM pass)
    h = jnp.dot(z, w1_ref[...], preferred_element_type=jnp.float32)
    h = jnp.maximum(h + b1_ref[...], 0.0)
    # Layer 2.
    h = jnp.dot(h.astype(jnp.bfloat16), w2_ref[...],
                preferred_element_type=jnp.float32)
    h = jnp.maximum(h + b2_ref[...], 0.0)
    # Layer 3: Tanh in f32 for range fidelity, store bf16 (halved writeback).
    h = jnp.dot(h.astype(jnp.bfloat16), w3_ref[...],
                preferred_element_type=jnp.float32)
    out_ref[...] = jnp.tanh(h + b3_ref[...]).astype(out_ref.dtype)


# --------------------------------------------------------------------------
# One-time parameter preparation (hoisted out of the per-call forward).
# --------------------------------------------------------------------------
def prepare_params(params):
    """Pad only the output feature dim to a lane multiple (for unmasked vst)
    and cast weights to bf16 once. Inner dims (latent/h1/h2) keep their true
    sizes: full-extent BlockSpecs are legal and intermediates never leave VMEM."""
    w1, b1, w2, b2, w3, b3 = params
    out_dim = w3.shape[1]
    out_p = _round_up(out_dim, LANE)
    prepped = (
        w1.astype(jnp.bfloat16), b1.astype(jnp.float32),
        w2.astype(jnp.bfloat16), b2.astype(jnp.float32),
        _pad_axis(w3, 1, out_p).astype(jnp.bfloat16),
        _pad_axis(b3, 1, out_p).astype(jnp.float32),
    )
    return prepped, out_dim


def pick_batch_tile(B):
    """Static batch-tile choice per chip generation:
       single-TC (v5e/v6e): one big tile (<=512 rows) -> minimal grid overhead;
       v7x (2 TCs): even number of tiles so both cores get work."""
    try:
        kind = jax.devices()[0].device_kind.lower()
    except Exception:
        kind = ""
    num_tc = 2 if ("v7" in kind or "7x" in kind) else 1
    b8 = _round_up(max(B, 1), SUBLANE)
    tiles = max(num_tc, pl.cdiv(b8, 512))      # each tile at most ~512 rows
    tiles = _round_up(tiles, num_tc)           # grid length multiple of #TCs
    return _round_up(pl.cdiv(b8, tiles), SUBLANE)


# --------------------------------------------------------------------------
# Jitted forward. `prepped` comes from prepare_params (call once per model).
# --------------------------------------------------------------------------
@functools.partial(jax.jit, static_argnames=("tb", "out_dim"))
def generator_forward(z, prepped, *, tb, out_dim):
    """z: [B, latent] float32. Returns [B, out_dim] bfloat16."""
    w1, b1, w2, b2, w3, b3 = prepped
    B, latent = z.shape
    h1, h2, out_p = w1.shape[1], w2.shape[1], w3.shape[1]

    b_p = _round_up(B, tb)
    zp = _pad_axis(z, 0, b_p)                  # no-op when B % tb == 0
    grid = (b_p // tb,)

    # Weights/biases: full-array block, constant index_map -> VMEM-resident.
    def resident(a):
        return pl.BlockSpec(a.shape, lambda i: (0,) * a.ndim)

    # Scheduler hint with TRUE (un-padded) dims.
    cost = pl.CostEstimate(
        flops=2 * B * (latent * h1 + h1 * h2 + h2 * out_dim),
        transcendentals=B * out_dim,
        bytes_accessed=(zp.size * 4
                        + (w1.size + w2.size + w3.size) * 2
                        + (b1.size + b2.size + b3.size) * 4
                        + b_p * out_p * 2),
    )

    out = pl.pallas_call(
        generator_mlp_kernel,
        out_shape=jax.ShapeDtypeStruct((b_p, out_p), jnp.bfloat16),
        grid=grid,
        in_specs=[
            pl.BlockSpec((tb, latent), lambda i: (i, 0)),   # z tile (pipelined)
            resident(w1), resident(b1),
            resident(w2), resident(b2),
            resident(w3), resident(b3),
        ],
        out_specs=pl.BlockSpec((tb, out_p), lambda i: (i, 0)),
        compiler_params=pltpu.CompilerParams(
            dimension_semantics=("parallel",)),
        cost_estimate=cost,
    )(zp, w1, b1, w2, b2, w3, b3)

    if b_p == B and out_p == out_dim:          # avoid a hidden output-sized copy
        return out
    return out[:B, :out_dim]


# --------------------------------------------------------------------------
# Parameter init (PyTorch nn.Linear-like fan_in scaling) and f32 reference.
# --------------------------------------------------------------------------
def init_params(key, latent, h1, h2, out_dim):
    """Weights stored pre-transposed as [in_features, out_features] so the
    kernel computes x @ W + b (== PyTorch's x @ W_pt.T + b)."""
    ks = jax.random.split(key, 6)

    def lin(kw, kb, fan_in, fan_out):
        bound = 1.0 / jnp.sqrt(fan_in)
        w = jax.random.uniform(kw, (fan_in, fan_out), jnp.float32, -bound, bound)
        b = jax.random.uniform(kb, (1, fan_out), jnp.float32, -bound, bound)
        return w, b

    w1, b1 = lin(ks[0], ks[1], latent, h1)
    w2, b2 = lin(ks[2], ks[3], h1, h2)
    w3, b3 = lin(ks[4], ks[5], h2, out_dim)
    return (w1, b1, w2, b2, w3, b3)


def reference_forward(z, params):
    """Pure-f32 JAX reference (matches the nn.Sequential MLP forward)."""
    w1, b1, w2, b2, w3, b3 = params
    h = jnp.maximum(z @ w1 + b1, 0.0)
    h = jnp.maximum(h @ w2 + b2, 0.0)
    return jnp.tanh(h @ w3 + b3)


if __name__ == "__main__":
    # Typical MLP-GAN generator shapes; batch sized so v7x gets an even grid
    # and v5e/v6e run it as a single tile.
    B, LATENT, H1, H2, OUT = 256, 32, 64, 128, 256

    key = jax.random.PRNGKey(0)
    k_z, k_p = jax.random.split(key)

    params = init_params(k_p, LATENT, H1, H2, OUT)
    prepped, out_dim = prepare_params(params)   # one-time, outside sampling loop
    tb = pick_batch_tile(B)                     # static per-chip tile choice

    # Equivalent of Generator.gen_latent_batch(B): z ~ N(0,1), shape [B, latent]
    z = jax.random.normal(k_z, (B, LATENT), dtype=jnp.float32)

    out = generator_forward(z, prepped, tb=tb, out_dim=out_dim)
    out = jax.block_until_ready(out)

    ref = reference_forward(z, params)
    assert out.shape == (B, OUT)
    assert out.dtype == jnp.bfloat16
    # bf16 matmul operands + bf16 output vs pure-f32 reference: tanh output is
    # bounded in [-1, 1], so an absolute tolerance is appropriate.
    assert jnp.allclose(out.astype(jnp.float32), ref, atol=5e-2, rtol=0.0), \
        "mismatch vs reference"

    print("KERNEL_OK")
</pallas_src>

<mosaic_0001>
module attributes {stable_mosaic.version = 11 : i64} {
  func.func @generator_mlp_kernel(%arg0: i32, %arg1: memref<256x32xf32, #tpu.memory_space<vmem>>, %arg2: memref<32x64xbf16, #tpu.memory_space<vmem>>, %arg3: memref<1x64xf32, #tpu.memory_space<vmem>>, %arg4: memref<64x128xbf16, #tpu.memory_space<vmem>>, %arg5: memref<1x128xf32, #tpu.memory_space<vmem>>, %arg6: memref<128x256xbf16, #tpu.memory_space<vmem>>, %arg7: memref<1x256xf32, #tpu.memory_space<vmem>>, %arg8: memref<256x256xbf16, #tpu.memory_space<vmem>>) attributes {dimension_semantics = [#tpu.dimension_semantics<parallel>], iteration_bounds = array<i64: 1>, scalar_prefetch = 0 : i64, scratch_operands = 0 : i64, tpu.core_type = #tpu.core_type<tc>, window_params = [{transform_indices = @transform_0, window_bounds = array<i64: 256, 32>}, {pipeline_mode = #tpu.pipeline_mode<synchronous>, transform_indices = @transform_1, window_bounds = array<i64: 32, 64>}, {pipeline_mode = #tpu.pipeline_mode<synchronous>, transform_indices = @transform_2, window_bounds = array<i64: 1, 64>}, {pipeline_mode = #tpu.pipeline_mode<synchronous>, transform_indices = @transform_3, window_bounds = array<i64: 64, 128>}, {pipeline_mode = #tpu.pipeline_mode<synchronous>, transform_indices = @transform_4, window_bounds = array<i64: 1, 128>}, {pipeline_mode = #tpu.pipeline_mode<synchronous>, transform_indices = @transform_5, window_bounds = array<i64: 128, 256>}, {pipeline_mode = #tpu.pipeline_mode<synchronous>, transform_indices = @transform_6, window_bounds = array<i64: 1, 256>}, {transform_indices = @transform_7, window_bounds = array<i64: 256, 256>}]} {
    %c0 = arith.constant 0 : index
    %c0_0 = arith.constant 0 : index
    %0 = vector.load %arg1[%c0, %c0_0] : memref<256x32xf32, #tpu.memory_space<vmem>>, vector<256x32xf32>
    %1 = arith.truncf %0 : vector<256x32xf32> to vector<256x32xbf16>
    %c0_1 = arith.constant 0 : index
    %c0_2 = arith.constant 0 : index
    %2 = vector.load %arg2[%c0_1, %c0_2] : memref<32x64xbf16, #tpu.memory_space<vmem>>, vector<32x64xbf16>
    %cst = arith.constant dense<0.000000e+00> : vector<256x64xf32>
    %3 = tpu.matmul %1, %2, %cst {dimension_numbers = #tpu.dot_dimension_numbers<[1], [0], [0], [1], [0, 0, 1, 1], [], []>} : vector<256x32xbf16>, vector<32x64xbf16>, vector<256x64xf32> -> vector<256x64xf32>
    %c0_3 = arith.constant 0 : index
    %c0_4 = arith.constant 0 : index
    %4 = vector.load %arg3[%c0_3, %c0_4] : memref<1x64xf32, #tpu.memory_space<vmem>>, vector<1x64xf32>
    %5 = vector.broadcast %4 : vector<1x64xf32> to vector<256x64xf32>
    %6 = arith.addf %3, %5 : vector<256x64xf32>
    %cst_5 = arith.constant 0.000000e+00 : f32
    %7 = vector.broadcast %cst_5 : f32 to vector<256x64xf32>
    %8 = arith.maximumf %6, %7 : vector<256x64xf32>
    %9 = arith.truncf %8 : vector<256x64xf32> to vector<256x64xbf16>
    %c0_6 = arith.constant 0 : index
    %c0_7 = arith.constant 0 : index
    %10 = vector.load %arg4[%c0_6, %c0_7] : memref<64x128xbf16, #tpu.memory_space<vmem>>, vector<64x128xbf16>
    %cst_8 = arith.constant dense<0.000000e+00> : vector<256x128xf32>
    %11 = tpu.matmul %9, %10, %cst_8 {dimension_numbers = #tpu.dot_dimension_numbers<[1], [0], [0], [1], [0, 0, 1, 1], [], []>} : vector<256x64xbf16>, vector<64x128xbf16>, vector<256x128xf32> -> vector<256x128xf32>
    %c0_9 = arith.constant 0 : index
    %c0_10 = arith.constant 0 : index
    %12 = vector.load %arg5[%c0_9, %c0_10] : memref<1x128xf32, #tpu.memory_space<vmem>>, vector<1x128xf32>
    %13 = vector.broadcast %12 : vector<1x128xf32> to vector<256x128xf32>
    %14 = arith.addf %11, %13 : vector<256x128xf32>
    %cst_11 = arith.constant 0.000000e+00 : f32
    %15 = vector.broadcast %cst_11 : f32 to vector<256x128xf32>
    %16 = arith.maximumf %14, %15 : vector<256x128xf32>
    %17 = arith.truncf %16 : vector<256x128xf32> to vector<256x128xbf16>
    %c0_12 = arith.constant 0 : index
    %c0_13 = arith.constant 0 : index
    %18 = vector.load %arg6[%c0_12, %c0_13] : memref<128x256xbf16, #tpu.memory_space<vmem>>, vector<128x256xbf16>
    %cst_14 = arith.constant dense<0.000000e+00> : vector<256x256xf32>
    %19 = tpu.matmul %17, %18, %cst_14 {dimension_numbers = #tpu.dot_dimension_numbers<[1], [0], [0], [1], [0, 0, 1, 1], [], []>} : vector<256x128xbf16>, vector<128x256xbf16>, vector<256x256xf32> -> vector<256x256xf32>
    %c0_15 = arith.constant 0 : index
    %c0_16 = arith.constant 0 : index
    %20 = vector.load %arg7[%c0_15, %c0_16] : memref<1x256xf32, #tpu.memory_space<vmem>>, vector<1x256xf32>
    %21 = vector.broadcast %20 : vector<1x256xf32> to vector<256x256xf32>
    %22 = arith.addf %19, %21 : vector<256x256xf32>
    %23 = math.tanh %22 : vector<256x256xf32>
    %24 = arith.truncf %23 : vector<256x256xf32> to vector<256x256xbf16>
    %c0_17 = arith.constant 0 : index
    %c0_18 = arith.constant 0 : index
    %25 = vector.load %arg8[%c0_17, %c0_18] : memref<256x256xbf16, #tpu.memory_space<vmem>>, vector<256x256xbf16>
    tpu.vector_store %arg8[%c0_17, %c0_18], %24 {strides = array<i32>} : memref<256x256xbf16, #tpu.memory_space<vmem>>, vector<256x256xbf16>,
    return
  }
  func.func @transform_0(%arg0: i32) -> (i32, i32) {
    %c0_i32 = arith.constant 0 : i32
    %c0_i32_0 = arith.constant 0 : i32
    return %arg0, %c0_i32 : i32, i32
  }
  func.func @transform_1(%arg0: i32) -> (i32, i32) {
    %c0_i32 = arith.constant 0 : i32
    %c0_i32_0 = arith.constant 0 : i32
    %c0_i32_1 = arith.constant 0 : i32
    return %c0_i32, %c0_i32_0 : i32, i32
  }
  func.func @transform_2(%arg0: i32) -> (i32, i32) {
    %c0_i32 = arith.constant 0 : i32
    %c0_i32_0 = arith.constant 0 : i32
    %c0_i32_1 = arith.constant 0 : i32
    return %c0_i32, %c0_i32_0 : i32, i32
  }
  func.func @transform_3(%arg0: i32) -> (i32, i32) {
    %c0_i32 = arith.constant 0 : i32
    %c0_i32_0 = arith.constant 0 : i32
    %c0_i32_1 = arith.constant 0 : i32
    return %c0_i32, %c0_i32_0 : i32, i32
  }
  func.func @transform_4(%arg0: i32) -> (i32, i32) {
    %c0_i32 = arith.constant 0 : i32
    %c0_i32_0 = arith.constant 0 : i32
    %c0_i32_1 = arith.constant 0 : i32
    return %c0_i32, %c0_i32_0 : i32, i32
  }
  func.func @transform_5(%arg0: i32) -> (i32, i32) {
    %c0_i32 = arith.constant 0 : i32
    %c0_i32_0 = arith.constant 0 : i32
    %c0_i32_1 = arith.constant 0 : i32
    return %c0_i32, %c0_i32_0 : i32, i32
  }
  func.func @transform_6(%arg0: i32) -> (i32, i32) {
    %c0_i32 = arith.constant 0 : i32
    %c0_i32_0 = arith.constant 0 : i32
    %c0_i32_1 = arith.constant 0 : i32
    return %c0_i32, %c0_i32_0 : i32, i32
  }
  func.func @transform_7(%arg0: i32) -> (i32, i32) {
    %c0_i32 = arith.constant 0 : i32
    %c0_i32_0 = arith.constant 0 : i32
    return %arg0, %c0_i32 : i32, i32
  }
}

</mosaic_0001>

<bundles_post_ra>
// kernel: generator_forward.1
= control target key start
LH: loop header
LB: loop body
LE: loop exit
PB: predicated region body
PF: predicated region fallthrough
CT: control target
= control target key end

     0   :  { %vm99_vm0 = vcmask 261120   ;;  %s2129_s0 = inlined_call_operand.vmem [shape: f32[256,32], index: 0, kind: input, shape index: {}]   ;;  %s2130_s1 = inlined_call_operand.vmem [shape: bf16[32,64], index: 1, kind: input, shape index: {}]   ;;  %s2131_s2 = inlined_call_operand.vmem [shape: f32[1,64], index: 2, kind: input, shape index: {}]   ;;  %s2132_s3 = inlined_call_operand.vmem [shape: bf16[64,128], index: 3, kind: input, shape index: {}]   ;;  %s2133_s4 = inlined_call_operand.vmem [shape: f32[1,128], index: 4, kind: input, shape index: {}]   ;;  %s2134_s5 = inlined_call_operand.vmem [shape: bf16[128,256], index: 5, kind: input, shape index: {}]   ;;  %s2135_s6 = inlined_call_operand.vmem [shape: f32[1,256], index: 6, kind: input, shape index: {}]   ;;  %s2136_s7 = inlined_call_operand.hbm [shape: bf16[256,256], index: 7, kind: output, shape index: {}]  }
   0x1   :  { %v1513_v0 = vld [vmem:[%s2130_s1] sm:$0xff]   ;;  %v1514_v1 = vld [vmem:[%s2130_s1 + $0x8] sm:$0xff]   ;;  %v30_v5 = vld [vmem:[%s2129_s0 + $0x10] sm:$0xff] }
   0x2   :  { %1417 = vmatprep.subr.bf16.mxu0 %v1513_v0  ;;  %v28_v2 = vld [vmem:[%s2129_s0] sm:$0xff]  ;;  %v29_v3 = vld [vmem:[%s2129_s0 + $0x8] sm:$0xff]  ;;  %v31_v6 = vld [vmem:[%s2129_s0 + $0x18] sm:$0xff] }
   0x3   :  { %1418 = vmatpush3.bf16.msra.mxu0 %v1513_v0  ;;  %v60_v4 = vpack.c.bf16 %v29_v3, %v28_v2  ;;  %v32_v7 = vld [vmem:[%s2129_s0 + $0x20] sm:$0xff]  ;;  %v33_v8 = vld [vmem:[%s2129_s0 + $0x28] sm:$0xff]  ;;  %v61_v9 = vpack.c.bf16 %v31_v6, %v30_v5  ;;  %v34_v11 = vld [vmem:[%s2129_s0 + $0x30] sm:$0xff] }
   0x4   :  { %1419 = vmatprep.subr.bf16.mxu0 %v1514_v1  ;;  %v62_v10 = vpack.c.bf16 %v33_v8, %v32_v7  ;;  %v35_v12 = vld [vmem:[%s2129_s0 + $0x38] sm:$0xff]  ;;  %v36_v13 = vld [vmem:[%s2129_s0 + $0x40] sm:$0xff]  ;;  %v37_v14 = vld [vmem:[%s2129_s0 + $0x48] sm:$0xff] }
   0x5   :  { %1421 = vmatprep.mubr.msk.bf16.mxu0 %vm99_vm0, %v60_v4  ;;  %v1515_v15 = vld [vmem:[%s2132_s3] sm:$0xff]   ;;  %v63_v16 = vpack.c.bf16 %v35_v12, %v34_v11  ;;  %v1516_v17 = vld [vmem:[%s2132_s3 + $0x8] sm:$0xff]   ;;  %v64_v18 = vpack.c.bf16 %v37_v14, %v36_v13  ;;  %v38_v19 = vld [vmem:[%s2129_s0 + $0x50] sm:$0xff] }
   0x6   :  { %1453 = vmatprep.subr.bf16.mxu1 %v1515_v15  ;;  %v39_v20 = vld [vmem:[%s2129_s0 + $0x58] sm:$0xff]  ;;  %v40_v21 = vld [vmem:[%s2129_s0 + $0x60] sm:$0xff]  ;;  %v41_v22 = vld [vmem:[%s2129_s0 + $0x68] sm:$0xff] }
   0x7   :  { %1420 = vmatpush3.bf16.msra.mxu0 %v1514_v1  ;;  %1454 = vmatpush3.bf16.msra.mxu1 %v1515_v15 }
   0x8   :  { %1455 = vmatprep.subr.bf16.mxu1 %v1516_v17 }
   0xa   :  { %1422 = vmatmul.mubr.msk.bf16.vlgmr.msra.gmra.mrb[0].mxu0 %vm99_vm0, %v61_v9 }
   0xb   :  { %1425 = vmatprep.mubr.msk.bf16.mxu0 %vm99_vm0, %v62_v10  ;;  %1456 = vmatpush3.bf16.msra.mxu1 %v1516_v17 }
  0x12   :  { %1426 = vmatmul.mubr.msk.bf16.gmra.mrb[4].mxu0 %vm99_vm0, %v63_v16 }
  0x13   :  { %1429 = vmatprep.mubr.msk.bf16.mxu0 %vm99_vm0, %v64_v18 }
  0x14   :  { %12 = vsyncpa [#allocation3], 0  ;;  %v65_v23 = vpack.c.bf16 %v39_v20, %v38_v19  ;;  %v66_v24 = vpack.c.bf16 %v41_v22, %v40_v21  ;;  %v42_v25 = vld [vmem:[%s2129_s0 + $0x70] sm:$0xff]  ;;  %v43_v26 = vld [vmem:[%s2129_s0 + $0x78] sm:$0xff]  ;;  %vm396_vm1 = vcmask 523264  }
  0x15   :  { %v44_v27 = vld [vmem:[%s2129_s0 + $0x80] sm:$0xff]  ;;  %v45_v28 = vld [vmem:[%s2129_s0 + $0x88] sm:$0xff]  ;;  %v67_v29 = vpack.c.bf16 %v43_v26, %v42_v25  ;;  %v46_v31 = vld [vmem:[%s2129_s0 + $0x90] sm:$0xff] }
  0x16   :  { %v68_v30 = vpack.c.bf16 %v45_v28, %v44_v27  ;;  %v47_v32 = vld [vmem:[%s2129_s0 + $0x98] sm:$0xff]  ;;  %v48_v33 = vld [vmem:[%s2129_s0 + $0xa0] sm:$0xff]  ;;  %v49_v34 = vld [vmem:[%s2129_s0 + $0xa8] sm:$0xff] }
  0x17   :  { %v69_v35 = vpack.c.bf16 %v47_v32, %v46_v31  ;;  %v70_v36 = vpack.c.bf16 %v49_v34, %v48_v33  ;;  %v50_v37 = vld [vmem:[%s2129_s0 + $0xb0] sm:$0xff]  ;;  %v51_v38 = vld [vmem:[%s2129_s0 + $0xb8] sm:$0xff]  ;;  %v52_v39 = vld [vmem:[%s2129_s0 + $0xc0] sm:$0xff] }
  0x18   :  { %v53_v40 = vld [vmem:[%s2129_s0 + $0xc8] sm:$0xff]  ;;  %v71_v41 = vpack.c.bf16 %v51_v38, %v50_v37  ;;  %v54_v43 = vld [vmem:[%s2129_s0 + $0xd0] sm:$0xff]  ;;  %v55_v44 = vld [vmem:[%s2129_s0 + $0xd8] sm:$0xff] }
  0x19   :  { %v72_v42 = vpack.c.bf16 %v53_v40, %v52_v39  ;;  %v56_v45 = vld [vmem:[%s2129_s0 + $0xe0] sm:$0xff]  ;;  %v57_v46 = vld [vmem:[%s2129_s0 + $0xe8] sm:$0xff]  ;;  %v73_v47 = vpack.c.bf16 %v55_v44, %v54_v43  ;;  %v58_v49 = vld [vmem:[%s2129_s0 + $0xf0] sm:$0xff] }
  0x1a   :  { %1430 = vmatmul.mubr.msk.bf16.gmra.mrb[8].mxu0 %vm99_vm0, %v65_v23  ;;  %v74_v48 = vpack.c.bf16 %v57_v46, %v56_v45  ;;  %v59_v50 = vld [vmem:[%s2129_s0 + $0xf8] sm:$0xff]  ;;  %v1517_v52 = vld [vmem:[%s2132_s3 + $0x10] sm:$0xff]   ;;  %v1519_v54 = vld [vmem:[%s2134_s5] ss:$8 sps:$4 sm:$0xff]  }
  0x1b   :  { %1433 = vmatprep.mubr.msk.bf16.mxu0 %vm99_vm0, %v66_v24  ;;  %v75_v51 = vpack.c.bf16 %v59_v50, %v58_v49  ;;  %1457 = vmatprep.subr.bf16.mxu1 %v1517_v52  ;;  %v1518_v53 = vld [vmem:[%s2132_s3 + $0x18] sm:$0xff]   ;;  %v1521_v55 = vld [vmem:[%s2134_s5 + $0x4] ss:$8 sps:$4 sm:$0xff]   ;;  %v1525_v59 = vld [vmem:[%s2134_s5 + $0x20] ss:$8 sps:$4 sm:$0xff]  }
  0x1c   :  { %1458 = vmatpush3.bf16.msra.mxu1 %v1517_v52  ;;  %v1524_v56 = vld [vmem:[%s2134_s5 + $0x14] ss:$8 sps:$4 sm:$0xff]   ;;  %762 = vmatprep.subr.bf16.mxu0 %v1521_v55  ;;  %v1522_v57 = vld [vmem:[%s2134_s5 + $0x10] ss:$8 sps:$4 sm:$0xff]   ;;  %v1527_v58 = vld [vmem:[%s2134_s5 + $0x24] ss:$8 sps:$4 sm:$0xff]  }
  0x1d   :  { %1459 = vmatprep.subr.bf16.mxu1 %v1518_v53  ;;  %763 = vmatpush1.bf16.msra.mxu0 %v1519_v54  ;;  %v1530_v60 = vld [vmem:[%s2134_s5 + $0x34] ss:$8 sps:$4 sm:$0xff]   ;;  %v1893_v61 = vld [vmem:[%s2134_s5 + $0x30] ss:$8 sps:$4 sm:$0xff]   ;;  %v1898_v62 = vld [vmem:[%s2134_s5 + $0x44] ss:$8 sps:$4 sm:$0xff]  }
  0x1e   :  { %764 = vmatprep.subr.bf16.mxu0 %v1524_v56  ;;  %v1904_v63 = vld [vmem:[%s2134_s5 + $0x40] ss:$8 sps:$4 sm:$0xff]   ;;  %v1910_v0 = vld [vmem:[%s2134_s5 + $0x54] ss:$8 sps:$4 sm:$0xff]   ;;  %v1916_v1 = vld [vmem:[%s2134_s5 + $0x50] ss:$8 sps:$4 sm:$0xff]  }
  0x1f   :  { %v1923_v2 = vld [vmem:[%s2131_s2] ss:$0 sm:$0xff] }
  0x20   :  { %1460 = vmatpush3.bf16.msra.mxu1 %v1518_v53 }
  0x21   :  { %1493 = vmatprep.subr.bf16.mxu1 %v1521_v55  ;;  %765 = vmatpush1.bf16.msra.mxu0 %v1522_v57 }
  0x22   :  { %1434 = vmatmul.mubr.msk.bf16.gmra.mrb[12].mxu0 %vm99_vm0, %v67_v29  ;;  %766 = vmatprep.subr.bf16.mxu0 %v1527_v58 }
  0x23   :  { %1437 = vmatprep.mubr.msk.bf16.mxu0 %vm99_vm0, %v68_v30 }
  0x25   :  { %767 = vmatpush1.bf16.msra.mxu0 %v1525_v59 }
  0x26   :  { %768 = vmatprep.subr.bf16.mxu0 %v1530_v60 }
  0x29   :  { %769 = vmatpush1.bf16.msra.mxu0 %v1893_v61 }
  0x2a   :  { %1438 = vmatmul.mubr.msk.bf16.gmra.mrb[16].mxu0 %vm99_vm0, %v69_v35  ;;  %770 = vmatprep.subr.bf16.mxu0 %v1898_v62 }
  0x2b   :  { %1441 = vmatprep.mubr.msk.bf16.mxu0 %vm99_vm0, %v70_v36 }
  0x2d   :  { %771 = vmatpush1.bf16.msra.mxu0 %v1904_v63 }
  0x2e   :  { %772 = vmatprep.subr.bf16.mxu0 %v1910_v0 }
  0x31   :  { %773 = vmatpush1.bf16.msra.mxu0 %v1916_v1 }
  0x32   :  { %1442 = vmatmul.mubr.msk.bf16.gmra.mrb[20].mxu0 %vm99_vm0, %v71_v41 }
  0x33   :  { %1445 = vmatprep.mubr.msk.bf16.mxu0 %vm99_vm0, %v72_v42 }
  0x3a   :  { %1446 = vmatmul.mubr.msk.bf16.gmra.mrb[24].mxu0 %vm99_vm0, %v73_v47 }
  0x3b   :  { %1449 = vmatprep.mubr.msk.bf16.mxu0 %vm99_vm0, %v74_v48 }
  0x42   :  { %1450 = vmatmul.mubr.msk.bf16.gmra.mrb[28].mxu0 %vm99_vm0, %v75_v51 }
  0xdd   :  { %v1423_v3 = vpop.f32.mrb[0].mxu0 }
  0xde   :  { %v191_v4 = vadd.f32 %v1423_v3, %v1923_v2  ;;  %v182_v5 = vpop.f32.mrb[1].mxu0 }
  0xdf   :  { %v183_v6 = vadd.f32 %v1923_v2, %v182_v5  ;;  %v1424_v7 = vpop.f32.mrb[2].mxu0 }
  0xe0   :  { %v194_v8 = vadd.f32 %v1424_v7, %v1923_v2  ;;  %v185_v9 = vpop.f32.mrb[3].mxu0  ;;  %v311_v11 = vmax.f32 %v191_v4, 0.0 }
  0xe1   :  { %v186_v10 = vadd.f32 %v1923_v2, %v185_v9  ;;  %v309_v13 = vmax.f32 %v183_v6, 0.0 }
  0xe2   :  { %v312_v12 = vmax.f32 %v194_v8, 0.0 }
  0xe3   :  { %v310_v14 = vmax.f32 %v186_v10, 0.0 }
  0xe4   :  { %v342_v15 = vpack.c.bf16 %v312_v12, %v311_v11 }
  0xe5   :  { %v1427_v16 = vpop.f32.mrb[4].mxu0  ;;  %v341_v17 = vpack.c.bf16 %v310_v14, %v309_v13 }
  0xe6   :  { %v207_v18 = vadd.f32 %v1427_v16, %v1923_v2  ;;  %v198_v19 = vpop.f32.mrb[5].mxu0 }
  0xe7   :  { %v199_v20 = vadd.f32 %v1923_v2, %v198_v19  ;;  %v1428_v21 = vpop.f32.mrb[6].mxu0  ;;  %1461 = vmatprep.mubr.msk.bf16.mxu1 %vm396_vm1, %v341_v17 }
  0xe8   :  { %v210_v22 = vadd.f32 %v1428_v21, %v1923_v2  ;;  %v201_v23 = vpop.f32.mrb[7].mxu0  ;;  %1462 = vmatmul.mubr.msk.bf16.vlgmr.msra.gmra.mrb[0].mxu1 %vm396_vm1, %v342_v15  ;;  %v315_v25 = vmax.f32 %v207_v18, 0.0 }
  0xe9   :  { %v202_v24 = vadd.f32 %v1923_v2, %v201_v23  ;;  %1501 = vmatpush1.bf16.msra.mxu1 %v1519_v54  ;;  %v313_v27 = vmax.f32 %v199_v20, 0.0 }
  0xea   :  { %v316_v26 = vmax.f32 %v210_v22, 0.0  ;;  %1494 = vmatprep.subr.bf16.mxu1 %v1524_v56 }
  0xeb   :  { %v314_v28 = vmax.f32 %v202_v24, 0.0 }
  0xec   :  { %v344_v29 = vpack.c.bf16 %v316_v26, %v315_v25 }
  0xed   :  { %v343_v30 = vpack.c.bf16 %v314_v28, %v313_v27  ;;  %v1431_v31 = vpop.f32.mrb[8].mxu0  ;;  %1502 = vmatpush1.bf16.msra.mxu1 %v1522_v57 }
  0xee   :  { %v223_v32 = vadd.f32 %v1431_v31, %v1923_v2  ;;  %v214_v33 = vpop.f32.mrb[9].mxu0  ;;  %1495 = vmatprep.subr.bf16.mxu1 %v1527_v58 }
  0xef   :  { %v215_v34 = vadd.f32 %v1923_v2, %v214_v33  ;;  %v1432_v35 = vpop.f32.mrb[10].mxu0  ;;  %1465 = vmatprep.mubr.msk.bf16.mxu1 %vm396_vm1, %v343_v30 }
  0xf0   :  { %v226_v36 = vadd.f32 %v1432_v35, %v1923_v2  ;;  %v217_v37 = vpop.f32.mrb[11].mxu0  ;;  %1466 = vmatmul.mubr.msk.bf16.gmra.mrb[4].mxu1 %vm396_vm1, %v344_v29  ;;  %v319_v39 = vmax.f32 %v223_v32, 0.0 }
  0xf1   :  { %v218_v38 = vadd.f32 %v1923_v2, %v217_v37  ;;  %1503 = vmatpush1.bf16.msra.mxu1 %v1525_v59  ;;  %v317_v41 = vmax.f32 %v215_v34, 0.0 }
  0xf2   :  { %v320_v40 = vmax.f32 %v226_v36, 0.0  ;;  %1496 = vmatprep.subr.bf16.mxu1 %v1530_v60 }
  0xf3   :  { %v318_v42 = vmax.f32 %v218_v38, 0.0 }
  0xf4   :  { %v346_v43 = vpack.c.bf16 %v320_v40, %v319_v39 }
  0xf5   :  { %v345_v44 = vpack.c.bf16 %v318_v42, %v317_v41  ;;  %v1435_v45 = vpop.f32.mrb[12].mxu0  ;;  %1504 = vmatpush1.bf16.msra.mxu1 %v1893_v61 }
  0xf6   :  { %v239_v46 = vadd.f32 %v1435_v45, %v1923_v2  ;;  %v230_v47 = vpop.f32.mrb[13].mxu0  ;;  %1497 = vmatprep.subr.bf16.mxu1 %v1898_v62 }
  0xf7   :  { %v231_v48 = vadd.f32 %v1923_v2, %v230_v47  ;;  %v1436_v49 = vpop.f32.mrb[14].mxu0  ;;  %1469 = vmatprep.mubr.msk.bf16.mxu1 %vm396_vm1, %v345_v44 }
  0xf8   :  { %v242_v50 = vadd.f32 %v1436_v49, %v1923_v2  ;;  %v233_v51 = vpop.f32.mrb[15].mxu0  ;;  %1470 = vmatmul.mubr.msk.bf16.gmra.mrb[8].mxu1 %vm396_vm1, %v346_v43  ;;  %v323_v53 = vmax.f32 %v239_v46, 0.0 }
  0xf9   :  { %v234_v52 = vadd.f32 %v1923_v2, %v233_v51  ;;  %1505 = vmatpush1.bf16.msra.mxu1 %v1904_v63  ;;  %v321_v55 = vmax.f32 %v231_v48, 0.0 }
  0xfa   :  { %v324_v54 = vmax.f32 %v242_v50, 0.0  ;;  %1498 = vmatprep.subr.bf16.mxu1 %v1910_v0 }
  0xfb   :  { %v322_v56 = vmax.f32 %v234_v52, 0.0  ;;  %v1539_v52 = vld [vmem:[%s2134_s5 + $0x64] ss:$8 sps:$4 sm:$0xff]  }
  0xfc   :  { %v348_v57 = vpack.c.bf16 %v324_v54, %v323_v53  ;;  %v1537_v53 = vld [vmem:[%s2134_s5 + $0x60] ss:$8 sps:$4 sm:$0xff]   ;;  %774 = vmatprep.subr.bf16.mxu0 %v1539_v52  ;;  %v1540_v54 = vld [vmem:[%s2134_s5 + $0x70] ss:$8 sps:$4 sm:$0xff]  }
  0xfd   :  { %v347_v58 = vpack.c.bf16 %v322_v56, %v321_v55  ;;  %v1439_v59 = vpop.f32.mrb[16].mxu0  ;;  %1506 = vmatpush1.bf16.msra.mxu1 %v1916_v1  ;;  %775 = vmatpush1.bf16.msra.mxu0 %v1537_v53  ;;  %v1695_v55 = vmov 0   ;;  %v1995_v56 = vld [vmem:[%s2133_s4] ss:$0 sm:$0xff] }
  0xfe   :  { %v255_v60 = vadd.f32 %v1439_v59, %v1923_v2  ;;  %v246_v61 = vpop.f32.mrb[17].mxu0  ;;  %1499 = vmatprep.subr.bf16.mxu1 %v1539_v52  ;;  %794 = vmatprep.mubr.bf16.mxu0 %v1695_v55 }
  0xff   :  { %v247_v62 = vadd.f32 %v1923_v2, %v246_v61  ;;  %v1440_v3 = vpop.f32.mrb[18].mxu0  ;;  %1473 = vmatprep.mubr.msk.bf16.mxu1 %vm396_vm1, %v347_v58 }
 0x100   :  { %v258_v63 = vadd.f32 %v1440_v3, %v1923_v2  ;;  %v249_v4 = vpop.f32.mrb[19].mxu0  ;;  %1474 = vmatmul.mubr.msk.bf16.gmra.mrb[12].mxu1 %vm396_vm1, %v348_v57  ;;  %v327_v5 = vmax.f32 %v255_v60, 0.0 }
 0x101   :  { %v250_v0 = vadd.f32 %v1923_v2, %v249_v4  ;;  %v325_v7 = vmax.f32 %v247_v62, 0.0  ;;  %1507 = vmatpush1.bf16.msra.mxu1 %v1537_v53 }
 0x102   :  { %v328_v6 = vmax.f32 %v258_v63, 0.0 }
 0x103   :  { %v326_v8 = vmax.f32 %v250_v0, 0.0 }
 0x104   :  { %v350_v1 = vpack.c.bf16 %v328_v6, %v327_v5 }
 0x105   :  { %v349_v9 = vpack.c.bf16 %v326_v8, %v325_v7  ;;  %v1443_v10 = vpop.f32.mrb[20].mxu0 }
 0x106   :  { %v271_v11 = vadd.f32 %v1443_v10, %v1923_v2  ;;  %v262_v12 = vpop.f32.mrb[21].mxu0 }
 0x107   :  { %v263_v13 = vadd.f32 %v1923_v2, %v262_v12  ;;  %v1444_v14 = vpop.f32.mrb[22].mxu0  ;;  %1477 = vmatprep.mubr.msk.bf16.mxu1 %vm396_vm1, %v349_v9 }
 0x108   :  { %v274_v15 = vadd.f32 %v1444_v14, %v1923_v2  ;;  %v265_v16 = vpop.f32.mrb[23].mxu0  ;;  %1478 = vmatmul.mubr.msk.bf16.gmra.mrb[16].mxu1 %vm396_vm1, %v350_v1  ;;  %v331_v18 = vmax.f32 %v271_v11, 0.0 }
 0x109   :  { %v266_v17 = vadd.f32 %v1923_v2, %v265_v16  ;;  %v329_v20 = vmax.f32 %v263_v13, 0.0 }
 0x10a   :  { %v332_v19 = vmax.f32 %v274_v15, 0.0 }
 0x10b   :  { %v330_v21 = vmax.f32 %v266_v17, 0.0 }
 0x10c   :  { %v352_v22 = vpack.c.bf16 %v332_v19, %v331_v18 }
 0x10d   :  { %v351_v23 = vpack.c.bf16 %v330_v21, %v329_v20  ;;  %v1447_v24 = vpop.f32.mrb[24].mxu0 }
 0x10e   :  { %v287_v25 = vadd.f32 %v1447_v24, %v1923_v2  ;;  %v278_v26 = vpop.f32.mrb[25].mxu0 }
 0x10f   :  { %v279_v27 = vadd.f32 %v1923_v2, %v278_v26  ;;  %1481 = vmatprep.mubr.msk.bf16.mxu1 %vm396_vm1, %v351_v23  ;;  %v1448_v28 = vpop.f32.mrb[26].mxu0 }
 0x110   :  { %v335_v29 = vmax.f32 %v287_v25, 0.0  ;;  %v290_v30 = vadd.f32 %v1448_v28, %v1923_v2  ;;  %1482 = vmatmul.mubr.msk.bf16.gmra.mrb[20].mxu1 %vm396_vm1, %v352_v22  ;;  %v281_v31 = vpop.f32.mrb[27].mxu0 }
 0x111   :  { %v333_v32 = vmax.f32 %v279_v27, 0.0  ;;  %v282_v33 = vadd.f32 %v1923_v2, %v281_v31 }
 0x112   :  { %v336_v34 = vmax.f32 %v290_v30, 0.0 }
 0x113   :  { %v334_v35 = vmax.f32 %v282_v33, 0.0 }
 0x114   :  { %v354_v36 = vpack.c.bf16 %v336_v34, %v335_v29 }
 0x115   :  { %v353_v37 = vpack.c.bf16 %v334_v35, %v333_v32  ;;  %v1451_v38 = vpop.f32.mrb[28].mxu0 }
 0x116   :  { %v303_v39 = vadd.f32 %v1451_v38, %v1923_v2  ;;  %v294_v40 = vpop.f32.mrb[29].mxu0 }
 0x117   :  { %1485 = vmatprep.mubr.msk.bf16.mxu1 %vm396_vm1, %v353_v37  ;;  %v295_v41 = vadd.f32 %v1923_v2, %v294_v40  ;;  %v1452_v42 = vpop.f32.mrb[30].mxu0 }
 0x118   :  { %1486 = vmatmul.mubr.msk.bf16.gmra.mrb[24].mxu1 %vm396_vm1, %v354_v36  ;;  %v339_v43 = vmax.f32 %v303_v39, 0.0  ;;  %v306_v44 = vadd.f32 %v1452_v42, %v1923_v2  ;;  %v297_v45 = vpop.f32.mrb[31].mxu0 }
 0x119   :  { %v337_v46 = vmax.f32 %v295_v41, 0.0  ;;  %v298_v47 = vadd.f32 %v1923_v2, %v297_v45  ;;  %v1542_v2 = vld [vmem:[%s2134_s5 + $0x74] ss:$8 sps:$4 sm:$0xff]  }
 0x11a   :  { %v340_v48 = vmax.f32 %v306_v44, 0.0  ;;  %776 = vmatprep.subr.bf16.mxu0 %v1542_v2  ;;  %1500 = vmatprep.subr.bf16.mxu1 %v1542_v2 }
 0x11b   :  { %v338_v49 = vmax.f32 %v298_v47, 0.0  ;;  %777 = vmatpush1.bf16.msra.mxu0 %v1540_v54  ;;  %1508 = vmatpush1.bf16.msra.mxu1 %v1540_v54 }
 0x11c   :  { %v356_v50 = vpack.c.bf16 %v340_v48, %v339_v43 }
 0x11d   :  { %v355_v51 = vpack.c.bf16 %v338_v49, %v337_v46 }
 0x11f   :  { %1489 = vmatprep.mubr.msk.bf16.mxu1 %vm396_vm1, %v355_v51 }
 0x120   :  { %1490 = vmatmul.mubr.msk.bf16.gmra.mrb[28].mxu1 %vm396_vm1, %v356_v50 }
 0x121   :  { %884 = vmatprep.mubr.bf16.mxu1 %v1695_v55 }
 0x1bb   :  { %v1463_v57 = vpop.f32.mrb[0].mxu1 }
 0x1bc   :  { %v488_v58 = vadd.f32 %v1463_v57, %v1995_v56  ;;  %v479_v59 = vpop.f32.mrb[1].mxu1 }
 0x1bd   :  { %v480_v60 = vadd.f32 %v1995_v56, %v479_v59  ;;  %v1464_v61 = vpop.f32.mrb[2].mxu1 }
 0x1be   :  { %v491_v62 = vadd.f32 %v1464_v61, %v1995_v56  ;;  %v482_v3 = vpop.f32.mrb[3].mxu1  ;;  %v608_v4 = vmax.f32 %v488_v58, 0.0 }
 0x1bf   :  { %v483_v63 = vadd.f32 %v1995_v56, %v482_v3  ;;  %v606_v5 = vmax.f32 %v480_v60, 0.0 }
 0x1c0   :  { %v609_v0 = vmax.f32 %v491_v62, 0.0 }
 0x1c1   :  { %v607_v6 = vmax.f32 %v483_v63, 0.0 }
 0x1c2   :  { %v639_v7 = vpack.c.bf16 %v609_v0, %v608_v4 }
 0x1c3   :  { %v638_v8 = vpack.c.bf16 %v607_v6, %v606_v5  ;;  %v1467_v1 = vpop.f32.mrb[4].mxu1 }
 0x1c4   :  { %v504_v9 = vadd.f32 %v1467_v1, %v1995_v56  ;;  %v495_v10 = vpop.f32.mrb[5].mxu1 }
 0x1c5   :  { %v496_v11 = vadd.f32 %v1995_v56, %v495_v10  ;;  %v1468_v12 = vpop.f32.mrb[6].mxu1  ;;  %795 = vmatmul.mubr.bf16.vlgmr.msra.gmra.mrb[32].mxu0 %v638_v8 }
 0x1c6   :  { %v507_v13 = vadd.f32 %v1468_v12, %v1995_v56  ;;  %v498_v14 = vpop.f32.mrb[7].mxu1  ;;  %804 = vmatprep.mubr.bf16.mxu0 %v1695_v55  ;;  %v612_v16 = vmax.f32 %v504_v9, 0.0 }
 0x1c7   :  { %v499_v15 = vadd.f32 %v1995_v56, %v498_v14  ;;  %v610_v18 = vmax.f32 %v496_v11, 0.0 }
 0x1c8   :  { %v613_v17 = vmax.f32 %v507_v13, 0.0 }
 0x1c9   :  { %v611_v19 = vmax.f32 %v499_v15, 0.0 }
 0x1ca   :  { %v641_v20 = vpack.c.bf16 %v613_v17, %v612_v16 }
 0x1cb   :  { %v640_v21 = vpack.c.bf16 %v611_v19, %v610_v18  ;;  %v1471_v22 = vpop.f32.mrb[8].mxu1 }
 0x1cc   :  { %v520_v23 = vadd.f32 %v1471_v22, %v1995_v56  ;;  %v511_v24 = vpop.f32.mrb[9].mxu1 }
 0x1cd   :  { %v512_v25 = vadd.f32 %v1995_v56, %v511_v24  ;;  %v1472_v26 = vpop.f32.mrb[10].mxu1  ;;  %805 = vmatmul.mubr.bf16.gmra.mrb[36].mxu0 %v639_v7 }
 0x1ce   :  { %v523_v27 = vadd.f32 %v1472_v26, %v1995_v56  ;;  %v514_v28 = vpop.f32.mrb[11].mxu1  ;;  %814 = vmatprep.mubr.bf16.mxu0 %v1695_v55  ;;  %v616_v30 = vmax.f32 %v520_v23, 0.0 }
 0x1cf   :  { %v515_v29 = vadd.f32 %v1995_v56, %v514_v28  ;;  %v614_v32 = vmax.f32 %v512_v25, 0.0 }
 0x1d0   :  { %v617_v31 = vmax.f32 %v523_v27, 0.0 }
 0x1d1   :  { %v615_v33 = vmax.f32 %v515_v29, 0.0 }
 0x1d2   :  { %v643_v34 = vpack.c.bf16 %v617_v31, %v616_v30 }
 0x1d3   :  { %v642_v35 = vpack.c.bf16 %v615_v33, %v614_v32  ;;  %v1475_v36 = vpop.f32.mrb[12].mxu1 }
 0x1d4   :  { %v536_v37 = vadd.f32 %v1475_v36, %v1995_v56  ;;  %v527_v38 = vpop.f32.mrb[13].mxu1 }
 0x1d5   :  { %v528_v39 = vadd.f32 %v1995_v56, %v527_v38  ;;  %v1476_v40 = vpop.f32.mrb[14].mxu1  ;;  %815 = vmatmul.mubr.bf16.gmra.mrb[40].mxu0 %v640_v21 }
 0x1d6   :  { %v539_v41 = vadd.f32 %v1476_v40, %v1995_v56  ;;  %v530_v42 = vpop.f32.mrb[15].mxu1  ;;  %824 = vmatprep.mubr.bf16.mxu0 %v1695_v55  ;;  %v620_v44 = vmax.f32 %v536_v37, 0.0 }
 0x1d7   :  { %v531_v43 = vadd.f32 %v1995_v56, %v530_v42  ;;  %v618_v46 = vmax.f32 %v528_v39, 0.0 }
 0x1d8   :  { %v621_v45 = vmax.f32 %v539_v41, 0.0 }
 0x1d9   :  { %v619_v47 = vmax.f32 %v531_v43, 0.0 }
 0x1da   :  { %v2016_v48 = vpack.c.bf16 %v621_v45, %v620_v44 }
 0x1db   :  { %v644_v49 = vpack.c.bf16 %v619_v47, %v618_v46  ;;  %v1479_v50 = vpop.f32.mrb[16].mxu1  ;;  %v670_v46 = vld [vmem:[%s2135_s6] sm:$0x3]  ;;  %s1696_s6 = smov [#allocation2]  }
 0x1dc   :  { %v552_v51 = vadd.f32 %v1479_v50, %v1995_v56  ;;  %v543_v52 = vpop.f32.mrb[17].mxu1  ;;  %s1248_s12 = sshll.u32 %s1696_s6, 4  ;;  %s1249_s12 = int_to_ptr.vmem [resolvable:$true] %s1248_s12 }
 0x1dd   :  { %v544_v53 = vadd.f32 %v1995_v56, %v543_v52  ;;  %v1480_v2 = vpop.f32.mrb[18].mxu1  ;;  %825 = vmatmul.mubr.bf16.gmra.mrb[44].mxu0 %v641_v20  ;;  %s1671_s1 = scalar_lea.vmem %s1249_s12, 4096  ;;  %p1676_p1 = scmp.lt.s32.totalorder %s1249_s12, %s1249_s12 }
 0x1de   :  { %v555_v54 = vadd.f32 %v1480_v2, %v1995_v56  ;;  %v546_v57 = vpop.f32.mrb[19].mxu1  ;;  %834 = vmatprep.mubr.bf16.mxu0 %v1695_v55  ;;  %v624_v59 = vmax.f32 %v552_v51, 0.0  ;;  %p1672_p0 = scmp.ne.s32.totalorder %s1249_s12, %s1671_s1  ;;  %p1677_p2 = scmp.lt.s32.totalorder %s1671_s1, %s1671_s1 }
 0x1df   :  { %v547_v58 = vadd.f32 %v1995_v56, %v546_v57  ;;  %v622_v61 = vmax.f32 %v544_v53, 0.0 }
 0x1e0   :  { %v625_v60 = vmax.f32 %v555_v54, 0.0  ;;  %p1678_p3 = por %p1677_p2, %p1676_p1 }
 0x1e1   :  { %v623_v62 = vmax.f32 %v547_v58, 0.0 }
 0x1e2   :  { %v647_v3 = vpack.c.bf16 %v625_v60, %v624_v59  ;;  %p1679_p4 = pnand %p1678_p3, %p1672_p0 }
 0x1e3   :  { %v646_v63 = vpack.c.bf16 %v623_v62, %v622_v61  ;;  %v1483_v4 = vpop.f32.mrb[20].mxu1 }
 0x1e4   :  { %v568_v0 = vadd.f32 %v1483_v4, %v1995_v56  ;;  %v559_v5 = vpop.f32.mrb[21].mxu1  ;;  %885 = vmatmul.mubr.bf16.vlgmr.msra.gmra.mrb[32].mxu1 %v647_v3 }
 0x1e5   :  { %v560_v6 = vadd.f32 %v1995_v56, %v559_v5  ;;  %v1484_v7 = vpop.f32.mrb[22].mxu1  ;;  %835 = vmatmul.mubr.bf16.gmra.mrb[48].mxu0 %v642_v35  ;;  %894 = vmatprep.mubr.bf16.mxu1 %v1695_v55 }
 0x1e6   :  { %v571_v8 = vadd.f32 %v1484_v7, %v1995_v56  ;;  %v562_v1 = vpop.f32.mrb[23].mxu1  ;;  %844 = vmatprep.mubr.bf16.mxu0 %v1695_v55  ;;  %v628_v10 = vmax.f32 %v568_v0, 0.0 }
 0x1e7   :  { %v563_v9 = vadd.f32 %v1995_v56, %v562_v1  ;;  %v626_v12 = vmax.f32 %v560_v6, 0.0 }
 0x1e8   :  { %v629_v11 = vmax.f32 %v571_v8, 0.0 }
 0x1e9   :  { %v627_v13 = vmax.f32 %v563_v9, 0.0 }
 0x1ea   :  { %v649_v14 = vpack.c.bf16 %v629_v11, %v628_v10 }
 0x1eb   :  { %v648_v15 = vpack.c.bf16 %v627_v13, %v626_v12  ;;  %v1487_v16 = vpop.f32.mrb[24].mxu1 }
 0x1ec   :  { %v584_v17 = vadd.f32 %v1487_v16, %v1995_v56  ;;  %v575_v18 = vpop.f32.mrb[25].mxu1 }
 0x1ed   :  { %v576_v19 = vadd.f32 %v1995_v56, %v575_v18  ;;  %845 = vmatmul.mubr.bf16.gmra.mrb[52].mxu0 %v643_v34  ;;  %895 = vmatmul.mubr.bf16.gmra.mrb[36].mxu1 %v648_v15  ;;  %v1488_v20 = vpop.f32.mrb[26].mxu1 }
 0x1ee   :  { %v632_v21 = vmax.f32 %v584_v17, 0.0  ;;  %v587_v22 = vadd.f32 %v1488_v20, %v1995_v56  ;;  %v578_v23 = vpop.f32.mrb[27].mxu1  ;;  %854 = vmatprep.mubr.bf16.mxu0 %v1695_v55  ;;  %904 = vmatprep.mubr.bf16.mxu1 %v1695_v55 }
 0x1ef   :  { %v630_v24 = vmax.f32 %v576_v19, 0.0  ;;  %v579_v25 = vadd.f32 %v1995_v56, %v578_v23 }
 0x1f0   :  { %v633_v26 = vmax.f32 %v587_v22, 0.0 }
 0x1f1   :  { %v631_v27 = vmax.f32 %v579_v25, 0.0 }
 0x1f2   :  { %v651_v28 = vpack.c.bf16 %v633_v26, %v632_v21 }
 0x1f3   :  { %v650_v29 = vpack.c.bf16 %v631_v27, %v630_v24  ;;  %v1491_v30 = vpop.f32.mrb[28].mxu1 }
 0x1f4   :  { %v600_v31 = vadd.f32 %v1491_v30, %v1995_v56  ;;  %v591_v32 = vpop.f32.mrb[29].mxu1 }
 0x1f5   :  { %855 = vmatmul.mubr.bf16.gmra.mrb[56].mxu0 %v644_v49  ;;  %905 = vmatmul.mubr.bf16.gmra.mrb[40].mxu1 %v649_v14  ;;  %v592_v33 = vadd.f32 %v1995_v56, %v591_v32  ;;  %v1492_v34 = vpop.f32.mrb[30].mxu1 }
 0x1f6   :  { %v636_v35 = vmax.f32 %v600_v31, 0.0  ;;  %864 = vmatprep.mubr.bf16.mxu0 %v1695_v55  ;;  %914 = vmatprep.mubr.bf16.mxu1 %v1695_v55  ;;  %v603_v36 = vadd.f32 %v1492_v34, %v1995_v56  ;;  %v594_v37 = vpop.f32.mrb[31].mxu1 }
 0x1f7   :  { %v634_v38 = vmax.f32 %v592_v33, 0.0  ;;  %v595_v39 = vadd.f32 %v1995_v56, %v594_v37  ;;  %v672_v56 = vlaneseq }
 0x1f8   :  { %v637_v40 = vmax.f32 %v603_v36, 0.0 }
 0x1f9   :  { %v635_v41 = vmax.f32 %v595_v39, 0.0  ;;  %v673_v44 = vshrl.u32 %v672_v56, 7 }
 0x1fa   :  { %v653_v42 = vpack.c.bf16 %v637_v40, %v636_v35 }
 0x1fb   :  { %v652_v43 = vpack.c.bf16 %v635_v41, %v634_v38  ;;  %v674_v45 = vsub.s32 0, %v673_v44  ;;  %v678_v47 = vsub.s32 1, %v673_v44 }
 0x1fd   :  { %865 = vmatmul.mubr.bf16.gmra.mrb[60].mxu0 %v2016_v48  ;;  %915 = vmatmul.mubr.bf16.gmra.mrb[44].mxu1 %v650_v29  ;;  %v2049_v48 = vrot.slane %v670_v46, %v674_v45  ;;  %v2051_v49 = vrot.slane %v670_v46, %v678_v47 }
 0x1fe   :  { %874 = vmatprep.mubr.bf16.mxu0 %v1695_v55  ;;  %924 = vmatprep.mubr.bf16.mxu1 %v1695_v55 }
 0x205   :  { %875 = vmatmul.mubr.bf16.gmra.mrb[64].mxu0 %v646_v63  ;;  %925 = vmatmul.mubr.bf16.gmra.mrb[48].mxu1 %v651_v28 }
 0x206   :  { %934 = vmatprep.mubr.bf16.mxu1 %v1695_v55 }
 0x20d   :  { %935 = vmatmul.mubr.bf16.gmra.mrb[52].mxu1 %v652_v43 }
 0x20e   :  { %944 = vmatprep.mubr.bf16.mxu1 %v1695_v55 }
 0x215   :  { %945 = vmatmul.mubr.bf16.gmra.mrb[56].mxu1 %v653_v42 }
 0x298   :  { %v796_v50 = vpop.f32.mrb[32].mxu0 }
 0x299   :  { %v797_v51 = vadd.f32 %v796_v50, %v2049_v48  ;;  %v798_v52 = vpop.f32.mrb[33].mxu0 }
 0x29a   :  { %v799_v53 = vadd.f32 %v798_v52, %v2051_v49  ;;  %v800_v55 = vpop.f32.mrb[34].mxu0 }
 0x29b   :  { %1543 = vtanh.f32 %v797_v51  ;;  %v801_v2 = vadd.f32 %v800_v55, %v2049_v48  ;;  %v802_v54 = vpop.f32.mrb[35].mxu0 }
 0x29c   :  { %1545 = vtanh.f32 %v799_v53  ;;  %v803_v57 = vadd.f32 %v802_v54, %v2051_v49 }
 0x29d   :  { %1547 = vtanh.f32 %v801_v2 }
 0x29e   :  { %1549 = vtanh.f32 %v803_v57 }
 0x2a0   :  { %v806_v58 = vpop.f32.mrb[36].mxu0 }
 0x2a1   :  { %v807_v59 = vadd.f32 %v806_v58, %v2049_v48  ;;  %v808_v60 = vpop.f32.mrb[37].mxu0 }
 0x2a2   :  { %v809_v61 = vadd.f32 %v808_v60, %v2051_v49  ;;  %v810_v62 = vpop.f32.mrb[38].mxu0 }
 0x2a3   :  { %1551 = vtanh.f32 %v807_v59  ;;  %v811_v3 = vadd.f32 %v810_v62, %v2049_v48  ;;  %v812_v63 = vpop.f32.mrb[39].mxu0 }
 0x2a4   :  { %1553 = vtanh.f32 %v809_v61  ;;  %v813_v4 = vadd.f32 %v812_v63, %v2051_v49 }
 0x2a5   :  { %v1544_v0 = vpop.eup %1543  ;;  %1555 = vtanh.f32 %v811_v3 }
 0x2a6   :  { %v1546_v5 = vpop.eup %1545  ;;  %1557 = vtanh.f32 %v813_v4 }
 0x2a7   :  { %v1548_v6 = vpop.eup %1547  ;;  %v1347_v7 = vpack.c.bf16 %v1546_v5, %v1544_v0 }
 0x2a8   :  { %v1550_v8 = vpop.eup %1549  ;;  %v816_v1 = vpop.f32.mrb[40].mxu0 }
 0x2a9   :  { %1211 = vst [vmem:[#allocation2] sm:$0xff] %v1347_v7  ;;  %v1348_v9 = vpack.c.bf16 %v1550_v8, %v1548_v6  ;;  %v817_v10 = vadd.f32 %v816_v1, %v2049_v48  ;;  %v818_v11 = vpop.f32.mrb[41].mxu0 }
 0x2aa   :  { %v819_v12 = vadd.f32 %v818_v11, %v2051_v49  ;;  %v820_v13 = vpop.f32.mrb[42].mxu0 }
 0x2ab   :  { %1212 = vst [vmem:[#allocation2 + $0x8] sm:$0xff] %v1348_v9  ;;  %1559 = vtanh.f32 %v817_v10  ;;  %v821_v14 = vadd.f32 %v820_v13, %v2049_v48  ;;  %v822_v15 = vpop.f32.mrb[43].mxu0 }
 0x2ac   :  { %1561 = vtanh.f32 %v819_v12  ;;  %v823_v16 = vadd.f32 %v822_v15, %v2051_v49 }
 0x2ad   :  { %v1552_v17 = vpop.eup %1551  ;;  %1563 = vtanh.f32 %v821_v14 }
 0x2ae   :  { %v1554_v18 = vpop.eup %1553  ;;  %1565 = vtanh.f32 %v823_v16 }
 0x2af   :  { %v1556_v19 = vpop.eup %1555  ;;  %v1349_v20 = vpack.c.bf16 %v1554_v18, %v1552_v17 }
 0x2b0   :  { %v1558_v21 = vpop.eup %1557  ;;  %v826_v22 = vpop.f32.mrb[44].mxu0 }
 0x2b1   :  { %1213 = vst [vmem:[#allocation2 + $0x10] sm:$0xff] %v1349_v20  ;;  %v1350_v23 = vpack.c.bf16 %v1558_v21, %v1556_v19  ;;  %v827_v24 = vadd.f32 %v826_v22, %v2049_v48  ;;  %v828_v25 = vpop.f32.mrb[45].mxu0 }
 0x2b2   :  { %v829_v26 = vadd.f32 %v828_v25, %v2051_v49  ;;  %v830_v27 = vpop.f32.mrb[46].mxu0 }
 0x2b3   :  { %1214 = vst [vmem:[#allocation2 + $0x18] sm:$0xff] %v1350_v23  ;;  %1567 = vtanh.f32 %v827_v24  ;;  %v831_v28 = vadd.f32 %v830_v27, %v2049_v48  ;;  %v832_v29 = vpop.f32.mrb[47].mxu0 }
 0x2b4   :  { %1569 = vtanh.f32 %v829_v26  ;;  %v833_v30 = vadd.f32 %v832_v29, %v2051_v49 }
 0x2b5   :  { %v1560_v31 = vpop.eup %1559  ;;  %1571 = vtanh.f32 %v831_v28 }
 0x2b6   :  { %v1562_v32 = vpop.eup %1561  ;;  %1573 = vtanh.f32 %v833_v30 }
 0x2b7   :  { %v1564_v33 = vpop.eup %1563  ;;  %v1351_v34 = vpack.c.bf16 %v1562_v32, %v1560_v31  ;;  %v886_v35 = vpop.f32.mrb[32].mxu1 }
 0x2b8   :  { %v1566_v36 = vpop.eup %1565  ;;  %v887_v37 = vadd.f32 %v886_v35, %v2049_v48  ;;  %v836_v38 = vpop.f32.mrb[48].mxu0 }
 0x2b9   :  { %v888_v39 = vpop.f32.mrb[33].mxu1  ;;  %1215 = vst [vmem:[#allocation2 + $0x20] sm:$0xff] %v1351_v34  ;;  %v1352_v40 = vpack.c.bf16 %v1566_v36, %v1564_v33  ;;  %v837_v41 = vadd.f32 %v836_v38, %v2049_v48  ;;  %v838_v43 = vpop.f32.mrb[49].mxu0 }
 0x2ba   :  { %v889_v42 = vadd.f32 %v888_v39, %v2051_v49  ;;  %v890_v56 = vpop.f32.mrb[34].mxu1  ;;  %1575 = vtanh.f32 %v887_v37  ;;  %v839_v44 = vadd.f32 %v838_v43, %v2051_v49  ;;  %v840_v46 = vpop.f32.mrb[50].mxu0 }
 0x2bb   :  { %v891_v45 = vadd.f32 %v890_v56, %v2049_v48  ;;  %v892_v47 = vpop.f32.mrb[35].mxu1  ;;  %1216 = vst [vmem:[#allocation2 + $0x28] sm:$0xff] %v1352_v40  ;;  %1577 = vtanh.f32 %v837_v41  ;;  %v841_v50 = vadd.f32 %v840_v46, %v2049_v48  ;;  %v842_v51 = vpop.f32.mrb[51].mxu0 }
 0x2bc   :  { %1579 = vtanh.f32 %v889_v42  ;;  %v893_v52 = vadd.f32 %v892_v47, %v2051_v49  ;;  %v843_v55 = vadd.f32 %v842_v51, %v2051_v49 }
 0x2bd   :  { %v1568_v53 = vpop.eup %1567  ;;  %1581 = vtanh.f32 %v839_v44 }
 0x2be   :  { %v1570_v2 = vpop.eup %1569  ;;  %1583 = vtanh.f32 %v891_v45 }
 0x2bf   :  { %v1572_v54 = vpop.eup %1571  ;;  %v1353_v57 = vpack.c.bf16 %v1570_v2, %v1568_v53  ;;  %1585 = vtanh.f32 %v841_v50 }
 0x2c0   :  { %v1574_v58 = vpop.eup %1573  ;;  %1587 = vtanh.f32 %v893_v52  ;;  %v846_v59 = vpop.f32.mrb[52].mxu0 }
 0x2c1   :  { %v896_v60 = vpop.f32.mrb[36].mxu1  ;;  %1217 = vst [vmem:[#allocation2 + $0x30] sm:$0xff] %v1353_v57  ;;  %v1354_v61 = vpack.c.bf16 %v1574_v58, %v1572_v54  ;;  %1589 = vtanh.f32 %v843_v55  ;;  %v847_v62 = vadd.f32 %v846_v59, %v2049_v48  ;;  %v848_v63 = vpop.f32.mrb[53].mxu0 }
 0x2c2   :  { %v897_v3 = vadd.f32 %v896_v60, %v2049_v48  ;;  %v898_v4 = vpop.f32.mrb[37].mxu1  ;;  %v849_v0 = vadd.f32 %v848_v63, %v2051_v49  ;;  %v850_v6 = vpop.f32.mrb[54].mxu0 }
 0x2c3   :  { %v899_v5 = vadd.f32 %v898_v4, %v2051_v49  ;;  %v900_v7 = vpop.f32.mrb[38].mxu1  ;;  %1218 = vst [vmem:[#allocation2 + $0x38] sm:$0xff] %v1354_v61  ;;  %1591 = vtanh.f32 %v847_v62  ;;  %v851_v8 = vadd.f32 %v850_v6, %v2049_v48  ;;  %v852_v1 = vpop.f32.mrb[55].mxu0 }
 0x2c4   :  { %v902_v9 = vpop.f32.mrb[39].mxu1  ;;  %v1576_v10 = vpop.eup %1575  ;;  %1593 = vtanh.f32 %v897_v3  ;;  %v901_v11 = vadd.f32 %v900_v7, %v2049_v48  ;;  %v853_v13 = vadd.f32 %v852_v1, %v2051_v49 }
 0x2c5   :  { %v1578_v12 = vpop.eup %1577  ;;  %1595 = vtanh.f32 %v849_v0  ;;  %v903_v15 = vadd.f32 %v902_v9, %v2051_v49 }
 0x2c6   :  { %v1580_v14 = vpop.eup %1579  ;;  %1597 = vtanh.f32 %v899_v5 }
 0x2c7   :  { %v1582_v16 = vpop.eup %1581  ;;  %v1365_v17 = vpack.c.bf16 %v1580_v14, %v1576_v10  ;;  %1599 = vtanh.f32 %v851_v8 }
 0x2c8   :  { %v1584_v18 = vpop.eup %1583  ;;  %v1355_v19 = vpack.c.bf16 %v1582_v16, %v1578_v12  ;;  %1601 = vtanh.f32 %v901_v11  ;;  %v856_v20 = vpop.f32.mrb[56].mxu0 }
 0x2c9   :  { %v906_v21 = vpop.f32.mrb[40].mxu1  ;;  %v1586_v22 = vpop.eup %1585  ;;  %1229 = vst [vmem:[#allocation2 + $0x90] sm:$0xff] %v1365_v17  ;;  %1603 = vtanh.f32 %v853_v13  ;;  %v857_v23 = vadd.f32 %v856_v20, %v2049_v48 }
 0x2ca   :  { %v907_v24 = vadd.f32 %v906_v21, %v2049_v48  ;;  %v858_v25 = vpop.f32.mrb[57].mxu0  ;;  %v908_v26 = vpop.f32.mrb[41].mxu1  ;;  %1219 = vst [vmem:[#allocation2 + $0x40] sm:$0xff] %v1355_v19  ;;  %1605 = vtanh.f32 %v903_v15 }
 0x2cb   :  { %v1588_v27 = vpop.eup %1587  ;;  %v859_v28 = vadd.f32 %v858_v25, %v2051_v49  ;;  %v909_v29 = vadd.f32 %v908_v26, %v2051_v49  ;;  %v860_v30 = vpop.f32.mrb[58].mxu0  ;;  %1607 = vtanh.f32 %v857_v23 }
 0x2cc   :  { %v910_v31 = vpop.f32.mrb[42].mxu1  ;;  %v1590_v32 = vpop.eup %1589  ;;  %v1366_v33 = vpack.c.bf16 %v1588_v27, %v1584_v18  ;;  %v861_v34 = vadd.f32 %v860_v30, %v2049_v48  ;;  %1609 = vtanh.f32 %v907_v24 }
 0x2cd   :  { %v862_v35 = vpop.f32.mrb[59].mxu0  ;;  %v912_v36 = vpop.f32.mrb[43].mxu1  ;;  %v1356_v37 = vpack.c.bf16 %v1590_v32, %v1586_v22  ;;  %v911_v38 = vadd.f32 %v910_v31, %v2049_v48  ;;  %1611 = vtanh.f32 %v859_v28 }
 0x2ce   :  { %v1592_v39 = vpop.eup %1591  ;;  %1230 = vst [vmem:[#allocation2 + $0x98] sm:$0xff] %v1366_v33  ;;  %v863_v40 = vadd.f32 %v862_v35, %v2051_v49  ;;  %1613 = vtanh.f32 %v909_v29  ;;  %v913_v42 = vadd.f32 %v912_v36, %v2051_v49 }
 0x2cf   :  { %v1594_v41 = vpop.eup %1593  ;;  %1220 = vst [vmem:[#allocation2 + $0x48] sm:$0xff] %v1356_v37  ;;  %1615 = vtanh.f32 %v861_v34 }
 0x2d0   :  { %v1596_v43 = vpop.eup %1595  ;;  %1617 = vtanh.f32 %v911_v38  ;;  %v866_v45 = vpop.f32.mrb[60].mxu0 }
 0x2d1   :  { %v1598_v56 = vpop.eup %1597  ;;  %v1357_v44 = vpack.c.bf16 %v1596_v43, %v1592_v39  ;;  %v916_v46 = vpop.f32.mrb[44].mxu1  ;;  %1619 = vtanh.f32 %v863_v40  ;;  %v867_v51 = vadd.f32 %v866_v45, %v2049_v48 }
 0x2d2   :  { %v1600_v47 = vpop.eup %1599  ;;  %v1367_v50 = vpack.c.bf16 %v1598_v56, %v1594_v41  ;;  %v917_v52 = vadd.f32 %v916_v46, %v2049_v48  ;;  %v868_v53 = vpop.f32.mrb[61].mxu0  ;;  %1621 = vtanh.f32 %v913_v42 }
 0x2d3   :  { %v918_v55 = vpop.f32.mrb[45].mxu1  ;;  %v1602_v2 = vpop.eup %1601  ;;  %1221 = vst [vmem:[#allocation2 + $0x50] sm:$0xff] %v1357_v44  ;;  %v869_v54 = vadd.f32 %v868_v53, %v2051_v49  ;;  %1623 = vtanh.f32 %v867_v51 }
 0x2d4   :  { %v919_v57 = vadd.f32 %v918_v55, %v2051_v49  ;;  %v870_v58 = vpop.f32.mrb[62].mxu0  ;;  %v920_v59 = vpop.f32.mrb[46].mxu1  ;;  %1231 = vst [vmem:[#allocation2 + $0xa0] sm:$0xff] %v1367_v50  ;;  %1625 = vtanh.f32 %v917_v52 }
 0x2d5   :  { %v1604_v60 = vpop.eup %1603  ;;  %v871_v61 = vadd.f32 %v870_v58, %v2049_v48  ;;  %v872_v62 = vpop.f32.mrb[63].mxu0  ;;  %v921_v0 = vadd.f32 %v920_v59, %v2049_v48  ;;  %1627 = vtanh.f32 %v869_v54 }
 0x2d6   :  { %v922_v3 = vpop.f32.mrb[47].mxu1  ;;  %v1606_v63 = vpop.eup %1605  ;;  %v1358_v4 = vpack.c.bf16 %v1604_v60, %v1600_v47  ;;  %v873_v7 = vadd.f32 %v872_v62, %v2051_v49  ;;  %1629 = vtanh.f32 %v919_v57 }
 0x2d7   :  { %v1608_v5 = vpop.eup %1607  ;;  %v1368_v6 = vpack.c.bf16 %v1606_v63, %v1602_v2  ;;  %v923_v1 = vadd.f32 %v922_v3, %v2051_v49  ;;  %1631 = vtanh.f32 %v871_v61 }
 0x2d8   :  { %v1610_v8 = vpop.eup %1609  ;;  %1222 = vst [vmem:[#allocation2 + $0x58] sm:$0xff] %v1358_v4  ;;  %1633 = vtanh.f32 %v921_v0  ;;  %v876_v12 = vpop.f32.mrb[64].mxu0 }
 0x2d9   :  { %v1612_v9 = vpop.eup %1611  ;;  %1232 = vst [vmem:[#allocation2 + $0xa8] sm:$0xff] %v1368_v6  ;;  %v926_v13 = vpop.f32.mrb[48].mxu1  ;;  %1635 = vtanh.f32 %v873_v7  ;;  %v877_v16 = vadd.f32 %v876_v12, %v2049_v48 }
 0x2da   :  { %v1614_v10 = vpop.eup %1613  ;;  %v1359_v11 = vpack.c.bf16 %v1612_v9, %v1608_v5  ;;  %v927_v17 = vadd.f32 %v926_v13, %v2049_v48  ;;  %v878_v18 = vpop.f32.mrb[65].mxu0  ;;  %1637 = vtanh.f32 %v923_v1 }
 0x2db   :  { %v1616_v14 = vpop.eup %1615  ;;  %v1369_v15 = vpack.c.bf16 %v1614_v10, %v1610_v8  ;;  %v928_v19 = vpop.f32.mrb[49].mxu1  ;;  %v879_v21 = vadd.f32 %v878_v18, %v2051_v49  ;;  %1639 = vtanh.f32 %v877_v16 }
 0x2dc   :  { %v1618_v20 = vpop.eup %1617  ;;  %1223 = vst [vmem:[#allocation2 + $0x60] sm:$0xff] %v1359_v11  ;;  %v929_v22 = vadd.f32 %v928_v19, %v2051_v49  ;;  %v880_v23 = vpop.f32.mrb[66].mxu0  ;;  %1641 = vtanh.f32 %v927_v17 }
 0x2dd   :  { %v930_v24 = vpop.f32.mrb[50].mxu1  ;;  %v1620_v25 = vpop.eup %1619  ;;  %1233 = vst [vmem:[#allocation2 + $0xb0] sm:$0xff] %v1369_v15  ;;  %v881_v26 = vadd.f32 %v880_v23, %v2049_v48  ;;  %1643 = vtanh.f32 %v879_v21 }
 0x2de   :  { %v882_v27 = vpop.f32.mrb[67].mxu0  ;;  %v932_v28 = vpop.f32.mrb[51].mxu1  ;;  %v1360_v30 = vpack.c.bf16 %v1620_v25, %v1616_v14  ;;  %v931_v31 = vadd.f32 %v930_v24, %v2049_v48  ;;  %1645 = vtanh.f32 %v929_v22 }
 0x2df   :  { %v1622_v29 = vpop.eup %1621  ;;  %v883_v34 = vadd.f32 %v882_v27, %v2051_v49  ;;  %v933_v36 = vadd.f32 %v932_v28, %v2051_v49  ;;  %1647 = vtanh.f32 %v881_v26 }
 0x2e0   :  { %v1624_v32 = vpop.eup %1623  ;;  %v1370_v33 = vpack.c.bf16 %v1622_v29, %v1618_v20  ;;  %1224 = vst [vmem:[#allocation2 + $0x68] sm:$0xff] %v1360_v30  ;;  %1649 = vtanh.f32 %v931_v31  ;;  %v936_v40 = vpop.f32.mrb[52].mxu1 }
 0x2e1   :  { %v1626_v35 = vpop.eup %1625  ;;  %1651 = vtanh.f32 %v883_v34  ;;  %v937_v43 = vadd.f32 %v936_v40, %v2049_v48  ;;  %v938_v56 = vpop.f32.mrb[53].mxu1 }
 0x2e2   :  { %v1628_v37 = vpop.eup %1627  ;;  %1234 = vst [vmem:[#allocation2 + $0xb8] sm:$0xff] %v1370_v33  ;;  %1653 = vtanh.f32 %v933_v36  ;;  %v939_v45 = vadd.f32 %v938_v56, %v2051_v49  ;;  %v940_v46 = vpop.f32.mrb[54].mxu1 }
 0x2e3   :  { %v1630_v38 = vpop.eup %1629  ;;  %v1361_v39 = vpack.c.bf16 %v1628_v37, %v1624_v32  ;;  %1655 = vtanh.f32 %v937_v43  ;;  %v941_v50 = vadd.f32 %v940_v46, %v2049_v48  ;;  %v942_v51 = vpop.f32.mrb[55].mxu1 }
 0x2e4   :  { %v1632_v41 = vpop.eup %1631  ;;  %v1371_v42 = vpack.c.bf16 %v1630_v38, %v1626_v35  ;;  %1657 = vtanh.f32 %v939_v45  ;;  %v943_v55 = vadd.f32 %v942_v51, %v2051_v49 }
 0x2e5   :  { %v1634_v44 = vpop.eup %1633  ;;  %1225 = vst [vmem:[#allocation2 + $0x70] sm:$0xff] %v1361_v39  ;;  %1659 = vtanh.f32 %v941_v50 }
 0x2e6   :  { %v1636_v47 = vpop.eup %1635  ;;  %1235 = vst [vmem:[#allocation2 + $0xc0] sm:$0xff] %v1371_v42  ;;  %1661 = vtanh.f32 %v943_v55 }
 0x2e7   :  { %v1638_v52 = vpop.eup %1637  ;;  %v1362_v53 = vpack.c.bf16 %v1636_v47, %v1632_v41 }
 0x2e8   :  { %v1640_v2 = vpop.eup %1639  ;;  %v1372_v54 = vpack.c.bf16 %v1638_v52, %v1634_v44  ;;  %v946_v61 = vpop.f32.mrb[56].mxu1 }
 0x2e9   :  { %v1642_v57 = vpop.eup %1641  ;;  %1226 = vst [vmem:[#allocation2 + $0x78] sm:$0xff] %v1362_v53  ;;  %v947_v63 = vadd.f32 %v946_v61, %v2049_v48  ;;  %v948_v4 = vpop.f32.mrb[57].mxu1 }
 0x2ea   :  { %v1644_v58 = vpop.eup %1643  ;;  %1236 = vst [vmem:[#allocation2 + $0xc8] sm:$0xff] %v1372_v54  ;;  %v949_v5 = vadd.f32 %v948_v4, %v2051_v49  ;;  %v950_v6 = vpop.f32.mrb[58].mxu1 }
 0x2eb   :  { %v1646_v59 = vpop.eup %1645  ;;  %v1363_v60 = vpack.c.bf16 %v1644_v58, %v1640_v2  ;;  %1663 = vtanh.f32 %v947_v63  ;;  %v951_v8 = vadd.f32 %v950_v6, %v2049_v48  ;;  %v952_v1 = vpop.f32.mrb[59].mxu1 }
 0x2ec   :  { %v1648_v62 = vpop.eup %1647  ;;  %v1373_v3 = vpack.c.bf16 %v1646_v59, %v1642_v57  ;;  %1665 = vtanh.f32 %v949_v5  ;;  %v953_v11 = vadd.f32 %v952_v1, %v2051_v49 }
 0x2ed   :  { %v1650_v0 = vpop.eup %1649  ;;  %1227 = vst [vmem:[#allocation2 + $0x80] sm:$0xff] %v1363_v60  ;;  %1667 = vtanh.f32 %v951_v8 }
 0x2ee   :  { %v1652_v7 = vpop.eup %1651  ;;  %1237 = vst [vmem:[#allocation2 + $0xd0] sm:$0xff] %v1373_v3  ;;  %1669 = vtanh.f32 %v953_v11 }
 0x2ef   :  { %v1654_v9 = vpop.eup %1653  ;;  %v1364_v10 = vpack.c.bf16 %v1652_v7, %v1648_v62 }
 0x2f0   :  { %v1656_v12 = vpop.eup %1655  ;;  %v1374_v13 = vpack.c.bf16 %v1654_v9, %v1650_v0 }
 0x2f1   :  { %v1658_v14 = vpop.eup %1657  ;;  %1228 = vst [vmem:[#allocation2 + $0x88] sm:$0xff] %v1364_v10 }
 0x2f2   :  { %v1660_v15 = vpop.eup %1659  ;;  %1238 = vst [vmem:[#allocation2 + $0xd8] sm:$0xff] %v1374_v13  ;;  %v1375_v16 = vpack.c.bf16 %v1658_v14, %v1656_v12 }
 0x2f3   :  { %v1662_v17 = vpop.eup %1661 }
 0x2f4   :  { %1239 = vst [vmem:[#allocation2 + $0xe0] sm:$0xff] %v1375_v16  ;;  %v1376_v18 = vpack.c.bf16 %v1662_v17, %v1660_v15 }
 0x2f5   :  { %v1664_v48 = vpop.eup %1663 }
 0x2f6   :  { %1240 = vst [vmem:[#allocation2 + $0xe8] sm:$0xff] %v1376_v18  ;;  %v1666_v19 = vpop.eup %1665 }
 0x2f7   :  { %v1668_v20 = vpop.eup %1667  ;;  %v1377_v21 = vpack.c.bf16 %v1666_v19, %v1664_v48 }
 0x2f8   :  { %v1670_v49 = vpop.eup %1669 }
 0x2f9   :  { %1241 = vst [vmem:[#allocation2 + $0xf0] sm:$0xff] %v1377_v21  ;;  %v1378_v22 = vpack.c.bf16 %v1670_v49, %v1668_v20 }
 0x2fb   :  { %1242 = vst [vmem:[#allocation2 + $0xf8] sm:$0xff] %v1378_v22 }
 0x2fc   :  { %1682 = shalt.err (!%p1679_p4)
}
 0x2fd   :  { %s1683_s15 = scalar_lea.hbm %s2136_s7, 4096 }
 0x2fe   :  { %p1684_p5 = scmp.ne.s32.totalorder %s2136_s7, %s1683_s15  ;;  %p1687_p6 = scmp.lt.u32.totalorder %s1683_s15, %s2136_s7 }
 0x300   :  { %p1689_p7 = pnand %p1687_p6, %p1684_p5 }
 0x302   :  { %1692 = shalt.err (!%p1689_p7)
}
 0x303   :  { %s1697_s20 = smov 128   ;;  %s1698_s21 = smov 8  }
 0x304   :  { %1254 = dma.vmem_to_hbm [thread:$0]  %s1249_s12, 4096, %s2136_s7, [#allocation3], %s1697_s20, %s1697_s20, %s1698_s21  }
 0x305   :  { %1693 = dma.done.wait [#allocation3], 4096  }
 0x306   :  { %1694 = vsyncadd [#allocation3], 4294963200 }
 0x307   :  { %1258 = vsyncpa [#allocation3], 1 }

</bundles_post_ra>
